<compile_context>
chip_gen: v6e
topology: v6e:2x2x1
jax: 0.10.0
libtpu: 0.0.40
codegen_flags: <defaults>
</compile_context>

<pallas_src>
import jax
import jax.numpy as jnp
from jax import lax
from jax.experimental import pallas as pl
from jax.experimental.pallas import tpu as pltpu

_LANE = 128
_TARGET_BLOCK_BYTES = 4 << 20   # ~4 MiB per input block
_VMEM_LIMIT_BYTES = 32 << 20    # 2 in + 2 out 4 MiB double-buffers + headroom


def _rsqrt_kernel(x_ref, o_ref):
    x = x_ref[...]
    if x.dtype == jnp.float32:
        o_ref[...] = lax.rsqrt(x)
    else:
        # Compute in f32 (v5e EUP/VPU lack bf16; matches torch f32 math),
        # cast back on store.
        o_ref[...] = lax.rsqrt(x.astype(jnp.float32)).astype(o_ref.dtype)


def rsqrt_pallas(x: jax.Array) -> jax.Array:
    orig_shape = x.shape
    orig_dtype = x.dtype
    n = x.size
    if n == 0:  # degenerate shape guard
        return x

    itemsize = jnp.dtype(orig_dtype).itemsize
    rows = -(-n // _LANE)  # cdiv

    # ~4 MiB blocks; dtype-aware so bf16 gets 2x the rows. Multiple of 8
    # sublanes so (block_rows, 128) always satisfies the (8,128) rule.
    max_block_rows = max(8, (_TARGET_BLOCK_BYTES // (_LANE * itemsize)) // 8 * 8)

    if rows <= max_block_rows:
        # Single full-extent block (always a legal block shape); one grid step.
        block_rows = rows
    else:
        # Big lane-dense blocks; grid >= 2 so megacore (v7x) can shard.
        block_rows = max_block_rows

    flat = x.reshape(-1)
    tail = rows * _LANE - n
    if tail:
        # Rare unaligned case: pad only the <128-element tail, with 1.0 so the
        # padded region produces rsqrt(1)=1 rather than inf.
        flat = jnp.concatenate([flat, jnp.ones((tail,), dtype=orig_dtype)])
    x2d = flat.reshape(rows, _LANE)

    grid = (pl.cdiv(rows, block_rows),)
    out2d = pl.pallas_call(
        _rsqrt_kernel,
        out_shape=jax.ShapeDtypeStruct((rows, _LANE), orig_dtype),
        grid_spec=pl.GridSpec(
            grid=grid,
            in_specs=[pl.BlockSpec((block_rows, _LANE), lambda i: (i, 0))],
            out_specs=pl.BlockSpec((block_rows, _LANE), lambda i: (i, 0)),
        ),
        compiler_params=pltpu.CompilerParams(
            # Elementwise -> independent blocks; lets v7x shard the DMA
            # stream across its 2 TensorCores when grid > 1.
            dimension_semantics=("parallel",),
            vmem_limit_bytes=_VMEM_LIMIT_BYTES,
        ),
        cost_estimate=pl.CostEstimate(
            flops=0, transcendentals=n, bytes_accessed=2 * n * itemsize),
    )(x2d)

    out_flat = out2d.reshape(-1)
    if tail:
        out_flat = out_flat[:n]
    return out_flat.reshape(orig_shape)


if __name__ == "__main__":
    key = jax.random.PRNGKey(0)
    # Positive values so rsqrt is well-defined (torch.rsqrt: neg -> NaN,
    # zero -> inf anyway).
    x = jax.random.uniform(key, (2, 4, 16, 16), dtype=jnp.float32,
                           minval=0.1, maxval=4.0)

    y = rsqrt_pallas(x)
    jax.block_until_ready(y)

    y_ref = lax.rsqrt(x)
    assert y.shape == x.shape and y.dtype == x.dtype
    assert jnp.allclose(y, y_ref, rtol=1e-6, atol=1e-6)
    print("KERNEL_OK")
</pallas_src>

<mosaic_0001>
module attributes {stable_mosaic.version = 11 : i64} {
  func.func @_rsqrt_kernel(%arg0: i32, %arg1: memref<16x128xf32, #tpu.memory_space<vmem>>, %arg2: memref<16x128xf32, #tpu.memory_space<vmem>>) attributes {dimension_semantics = [#tpu.dimension_semantics<parallel>], iteration_bounds = array<i64: 1>, scalar_prefetch = 0 : i64, scratch_operands = 0 : i64, tpu.core_type = #tpu.core_type<tc>, window_params = [{transform_indices = @transform_0, window_bounds = array<i64: 16, 128>}, {transform_indices = @transform_1, window_bounds = array<i64: 16, 128>}]} {
    %c0 = arith.constant 0 : index
    %c0_0 = arith.constant 0 : index
    %0 = vector.load %arg1[%c0, %c0_0] : memref<16x128xf32, #tpu.memory_space<vmem>>, vector<16x128xf32>
    %1 = math.rsqrt %0 : vector<16x128xf32>
    %c0_1 = arith.constant 0 : index
    %c0_2 = arith.constant 0 : index
    %2 = vector.load %arg2[%c0_1, %c0_2] : memref<16x128xf32, #tpu.memory_space<vmem>>, vector<16x128xf32>
    tpu.vector_store %arg2[%c0_1, %c0_2], %1 {strides = array<i32>} : memref<16x128xf32, #tpu.memory_space<vmem>>, vector<16x128xf32>,
    return
  }
  func.func @transform_0(%arg0: i32) -> (i32, i32) {
    %c0_i32 = arith.constant 0 : i32
    %c0_i32_0 = arith.constant 0 : i32
    return %arg0, %c0_i32 : i32, i32
  }
  func.func @transform_1(%arg0: i32) -> (i32, i32) {
    %c0_i32 = arith.constant 0 : i32
    %c0_i32_0 = arith.constant 0 : i32
    return %arg0, %c0_i32 : i32, i32
  }
}

</mosaic_0001>

<bundles_post_ra>
// kernel: tpu_custom_call.1
= control target key start
LH: loop header
LB: loop body
LE: loop exit
PB: predicated region body
PF: predicated region fallthrough
CT: control target
= control target key end

     0   :  { %6 = vsyncpa [#allocation3], 0  ;;  %s118_s0 = inlined_call_operand.hbm [shape: f32[16,128], index: 0, kind: input, shape index: {}]   ;;  %s119_s1 = inlined_call_operand.hbm [shape: f32[16,128], index: 1, kind: output, shape index: {}]  }
   0x1   :  { %7 = vsyncpa [#allocation4], 0  ;;  %s98_s6 = smov [#allocation2]  }
   0x2   :  { %s13_s7 = sshll.u32 %s98_s6, 4  ;;  %s14_s7 = int_to_ptr.vmem [resolvable:$true] %s13_s7 }
   0x3   :  { %s62_s8 = scalar_lea.vmem %s14_s7, 256  ;;  %p67_p1 = scmp.lt.s32.totalorder %s14_s7, %s14_s7 }
   0x4   :  { %p63_p0 = scmp.ne.s32.totalorder %s14_s7, %s62_s8  ;;  %p68_p2 = scmp.lt.s32.totalorder %s62_s8, %s62_s8 }
   0x6   :  { %p69_p3 = por %p68_p2, %p67_p1 }
   0x8   :  { %p70_p4 = pnand %p69_p3, %p63_p0 }
   0xa   :  { %73 = shalt.err (!%p70_p4)
}
   0xb   :  { %s99_s9 = smov 128   ;;  %s100_s10 = smov 8  }
   0xc   :  { %19 = dma.hbm_to_vmem [thread:$0]  %s118_s0, 256, %s14_s7, [#allocation3], %s99_s9, %s99_s9, %s100_s10  }
   0xd   :  { %94 = dma.done.wait [#allocation3], 256  }
   0xe   :  { %95 = vsyncadd [#allocation3], 4294967040  ;;  %v23_v0 = vld [vmem:[#allocation2] sm:$0xff]  ;;  %v24_v1 = vld [vmem:[#allocation2 + $0x8] sm:$0xff]  ;;  %s101_s13 = smov [#allocation5]  }
   0xf   :  { %50 = vrsqrt.f32 %v23_v0  ;;  %s34_s14 = sshll.u32 %s101_s13, 4  ;;  %s35_s14 = int_to_ptr.vmem [resolvable:$true] %s34_s14 }
  0x10   :  { %52 = vrsqrt.f32 %v24_v1  ;;  %s74_s15 = scalar_lea.vmem %s35_s14, 256  ;;  %p79_p6 = scmp.lt.s32.totalorder %s35_s14, %s35_s14 }
  0x11   :  { %p75_p5 = scmp.ne.s32.totalorder %s35_s14, %s74_s15  ;;  %p80_p7 = scmp.lt.s32.totalorder %s74_s15, %s74_s15 }
  0x13   :  { %p81_p8 = por %p80_p7, %p79_p6 }
  0x15   :  { %p82_p9 = pnand %p81_p8, %p75_p5 }
  0x1c   :  { %v51_v2 = vpop.eup %50 }
  0x1d   :  { %v53_v3 = vpop.eup %52  ;;  %27 = vst [vmem:[#allocation5] sm:$0xff] %v51_v2 }
  0x1e   :  { %28 = vst [vmem:[#allocation5 + $0x8] sm:$0xff] %v53_v3 }
  0x1f   :  { %85 = shalt.err (!%p82_p9)
}
  0x20   :  { %40 = dma.vmem_to_hbm [thread:$0]  %s35_s14, 256, %s119_s1, [#allocation4], %s99_s9, %s99_s9, %s100_s10  }
  0x21   :  { %96 = dma.done.wait [#allocation4], 256  }
  0x22   :  { %97 = vsyncadd [#allocation4], 4294967040 }
  0x23   :  { %44 = vsyncpa [#allocation3], 1 }
  0x24   :  { %45 = vsyncpa [#allocation4], 1 }

</bundles_post_ra>
